<compile_context>
chip_gen: v6e
topology: v6e:2x2x1
jax: 0.10.0
libtpu: 0.0.40
codegen_flags: <defaults>
</compile_context>

<pallas_src>
import functools

import jax
import jax.numpy as jnp
from jax.experimental import pallas as pl
from jax.experimental.pallas import tpu as pltpu

_LANE = 128
_SUBLANE = 8


def _round_up(x, m):
    return ((x + m - 1) // m) * m


def _const_spec(shape):
    zeros = (0,) * len(shape)
    return pl.BlockSpec(shape, lambda b, _z=zeros: _z)


# ----------------------------------------------------------------------------
# Kernel
# ----------------------------------------------------------------------------
def _double_att_deepset_kernel(attn_in_ref, state_ref,
                               w_att_ref, b_att_ref,
                               w1_ref, b1_ref,
                               w2_ref, b2_ref,
                               out_ref,
                               *, e, n_true):
    # attn_in_ref : (TB, I+Hs)   -- [instruction | hidden_state]
    # state_ref   : (TB, Np, E)  -- Np = round_up(N, 8)
    # w_att       : (I+Hs, 2E)   block-diag [[Wg, 0], [0, Wh]]   b_att: (1, 2E)
    # w1          : (E,  Hp) bf16        b1: (1, Hp) f32
    # w2          : (Hp, Op) bf16        b2: (1, Op) f32
    # out_ref     : (TB, Op) f32
    attn_in = attn_in_ref[...]

    # Fused goal + hidden-state attention: one matmul, one bias add, one
    # sigmoid (f32 — tiny K, pure latency in front of the big matmuls).
    att2 = jax.nn.sigmoid(
        jnp.dot(attn_in, w_att_ref[...], preferred_element_type=jnp.float32)
        + b_att_ref[...])                                     # (TB, 2E)
    att = att2[:, :e] * att2[:, e:]                           # goal_att * hs_att

    state = state_ref[...]                                    # (TB, Np, E)
    tb, n_pad, _ = state.shape
    gated = att[:, None, :] * state                           # (TB, Np, E)
    # Np is a multiple of 8 -> this reshape is a pure sublane relabeling.
    gated2d = gated.reshape(tb * n_pad, e)                    # (TB*Np, E)

    # scaler_layer: Linear(E->H) + ReLU, Linear(H->O) + Sigmoid.
    # bf16 operands on the MXU, f32 accumulation + f32 elementwise.
    h = jnp.dot(gated2d.astype(w1_ref.dtype), w1_ref[...],
                preferred_element_type=jnp.float32) + b1_ref[...]
    h = jnp.maximum(h, 0.0)                                   # (TB*Np, Hp)
    y = jax.nn.sigmoid(
        jnp.dot(h.astype(w2_ref.dtype), w2_ref[...],
                preferred_element_type=jnp.float32) + b2_ref[...])  # (TB*Np, Op)

    op = y.shape[-1]
    y3 = y.reshape(tb, n_pad, op)
    if n_true != n_pad:
        # Mask wrapper-padded set rows so the mean divides by the TRUE N.
        row = jax.lax.broadcasted_iota(jnp.int32, (n_pad, op), 0)
        y3 = y3 * (row < n_true).astype(y3.dtype)[None, :, :]
    out_ref[...] = jnp.sum(y3, axis=1) * (1.0 / n_true)


# ----------------------------------------------------------------------------
# One-time parameter preprocessing (hoisted out of the per-call wrapper)
# ----------------------------------------------------------------------------
def prepare_params(params, *, matmul_dtype=jnp.bfloat16):
    wg = params["w_goal"].T                       # (I, E)
    wh = params["w_hs"].T                         # (Hs, E)
    I, E = wg.shape
    Hs = wh.shape[0]

    # Fused block-diagonal attention weight / bias.
    w_att = jnp.zeros((I + Hs, 2 * E), jnp.float32)
    w_att = w_att.at[:I, :E].set(wg)
    w_att = w_att.at[I:, E:].set(wh)
    b_att = jnp.concatenate([params["b_goal"], params["b_hs"]])[None, :]  # (1, 2E)

    w1 = params["w1"].T                           # (E, H)
    w2 = params["w2"].T                           # (H, O)
    H, O = w2.shape
    Hp = _round_up(H, _LANE)
    Op = _round_up(O, _LANE)
    # Padded H lanes: relu(x@0 + 0) = 0 and the padded w2 rows are zero, so
    # they contribute nothing.  Padded O lanes are sliced off by the caller.
    # NOTE: this relies on the scaler activation satisfying f(0)=0 (ReLU).
    w1p = jnp.pad(w1, ((0, 0), (0, Hp - H))).astype(matmul_dtype)
    b1p = jnp.pad(params["b1"][None, :], ((0, 0), (0, Hp - H)))
    w2p = jnp.pad(w2, ((0, Hp - H), (0, Op - O))).astype(matmul_dtype)
    b2p = jnp.pad(params["b2"][None, :], ((0, 0), (0, Op - O)))

    return {
        "w_att": w_att, "b_att": b_att,
        "w1": w1p, "b1": b1p, "w2": w2p, "b2": b2p,
        "dims": {"I": I, "Hs": Hs, "E": E, "H": H, "O": O, "Hp": Hp, "Op": Op},
    }


def _choose_tb(B, n_pad, *, target_rows=512):
    """Rows per grid step = tb * n_pad.

    tb is a multiple of 8 (sublane-aligned block second-to-last dim), targets
    ~512 MXU rows per step, and keeps >= 2 grid steps when the batch allows so
    dimension_semantics=("parallel",) can split the grid across 2 TensorCores.
    """
    b8 = _round_up(B, _SUBLANE)
    tb = _round_up(max(1, target_rows // n_pad), _SUBLANE)
    tb = min(tb, b8)
    if b8 >= 2 * _SUBLANE:
        tb = min(tb, _round_up(b8 // 2, _SUBLANE))
    return tb


# ----------------------------------------------------------------------------
# Forward wrapper
# ----------------------------------------------------------------------------
def double_att_deepset(state, instruction, hidden_state, prepared, *, tb=None):
    """Forward of DoubleAttDeepSet (aggregate='mean', last_activation='sigmoid').

    state:        (B, N, E) f32 dense set of entity embeddings
    instruction:  (B, I)    f32
    hidden_state: (B, Hs)   f32
    prepared:     output of prepare_params()
    """
    # TODO(synk): format_state / pad_sequence of genuinely ragged sets happens
    # outside the kernel; `state` is assumed dense (B, N, E) and the mean
    # divides by N (matching full_state.mean(1)).  Per-batch ragged lengths
    # would need scalar-prefetched lengths + a per-row masked divide.
    B, N, E = state.shape
    d = prepared["dims"]
    assert E == d["E"], (E, d["E"])
    I, Hs, Hp, Op, O = d["I"], d["Hs"], d["Hp"], d["Op"], d["O"]
    IH = I + Hs

    # Fused attention input [instruction | hidden_state].
    attn_in = jnp.concatenate([instruction, hidden_state], axis=1)  # (B, I+Hs)

    # Pad the set dim to a multiple of 8 (masked out inside the kernel).
    Np = _round_up(N, _SUBLANE)
    if Np != N:
        state = jnp.pad(state, ((0, 0), (0, Np - N), (0, 0)))

    if tb is None:
        tb = _choose_tb(B, Np)
    n_blocks = pl.cdiv(B, tb)                 # ideally even (2 TCs on v7x)
    Bp = n_blocks * tb
    if Bp != B:
        pad = Bp - B
        state = jnp.pad(state, ((0, pad), (0, 0), (0, 0)))
        attn_in = jnp.pad(attn_in, ((0, pad), (0, 0)))

    kernel = functools.partial(_double_att_deepset_kernel, e=E, n_true=N)

    flops = 2 * Bp * IH * 2 * E + 2 * Bp * Np * (E * Hp + Hp * Op)
    transcendentals = Bp * 2 * E + Bp * Np * Op
    bytes_accessed = (4 * (Bp * Np * E + Bp * IH + Bp * Op)
                      + 4 * (IH * 2 * E + 2 * E + Hp + Op)
                      + 2 * (E * Hp + Hp * Op))

    out = pl.pallas_call(
        kernel,
        out_shape=jax.ShapeDtypeStruct((Bp, Op), jnp.float32),
        grid_spec=pltpu.PrefetchScalarGridSpec(
            num_scalar_prefetch=0,
            grid=(n_blocks,),
            in_specs=[
                pl.BlockSpec((tb, IH), lambda b: (b, 0)),        # [instr | hs]
                pl.BlockSpec((tb, Np, E), lambda b: (b, 0, 0)),  # state slab
                _const_spec((IH, 2 * E)),                        # fused att W
                _const_spec((1, 2 * E)),                         # fused att b
                _const_spec((E, Hp)),                            # w1 (bf16, padded)
                _const_spec((1, Hp)),                            # b1
                _const_spec((Hp, Op)),                           # w2 (bf16, padded)
                _const_spec((1, Op)),                            # b2
            ],
            out_specs=pl.BlockSpec((tb, Op), lambda b: (b, 0)),
        ),
        compiler_params=pltpu.CompilerParams(
            dimension_semantics=("parallel",),
        ),
        cost_estimate=pl.CostEstimate(
            flops=flops,
            transcendentals=transcendentals,
            bytes_accessed=bytes_accessed,
        ),
    )(attn_in, state,
      prepared["w_att"], prepared["b_att"],
      prepared["w1"], prepared["b1"],
      prepared["w2"], prepared["b2"])

    return out[:B, :O]


# ----------------------------------------------------------------------------
# Pure-JAX reference (mirrors DoubleAttDeepSet.forward, all f32)
# ----------------------------------------------------------------------------
def reference_forward(state, instruction, hidden_state, params):
    goal_att = jax.nn.sigmoid(instruction @ params["w_goal"].T + params["b_goal"])
    hs_att = jax.nn.sigmoid(hidden_state @ params["w_hs"].T + params["b_hs"])
    full = hs_att[:, None, :] * goal_att[:, None, :] * state
    h = jnp.maximum(full @ params["w1"].T + params["b1"], 0.0)
    y = jax.nn.sigmoid(h @ params["w2"].T + params["b2"])
    return y.mean(axis=1)


def init_params(key, instruction_embedding, state_embedding, hidden_state_size,
                hidden_size, output_size):
    ks = jax.random.split(key, 8)
    scale = 0.1
    E, I, Hs = state_embedding, instruction_embedding, hidden_state_size
    return {
        # goal_attention_layer: Linear(I -> E)
        "w_goal": scale * jax.random.normal(ks[0], (E, I), jnp.float32),
        "b_goal": scale * jax.random.normal(ks[1], (E,), jnp.float32),
        # hidden_state_attention_layer: Linear(Hs -> E)
        "w_hs": scale * jax.random.normal(ks[2], (E, Hs), jnp.float32),
        "b_hs": scale * jax.random.normal(ks[3], (E,), jnp.float32),
        # scaler_layer: Linear(E -> H), Linear(H -> O)
        "w1": scale * jax.random.normal(ks[4], (hidden_size, E), jnp.float32),
        "b1": scale * jax.random.normal(ks[5], (hidden_size,), jnp.float32),
        "w2": scale * jax.random.normal(ks[6], (output_size, hidden_size), jnp.float32),
        "b2": scale * jax.random.normal(ks[7], (output_size,), jnp.float32),
    }


if __name__ == "__main__":
    state_embedding = 16       # E
    hidden_state_size = 24     # Hs
    instruction_embedding = 24 # I
    hidden_size = 32           # scaler_layer_params['hidden_size']
    output_size = 16           # scaler_layer_params['output_size']

    key = jax.random.PRNGKey(0)
    k_params, k_data = jax.random.split(key)
    params = init_params(k_params, instruction_embedding, state_embedding,
                         hidden_state_size, hidden_size, output_size)
    prepared = prepare_params(params)   # one-time weight prep (transpose/fuse/pad/bf16)

    # Two shape cases: (a) B and N both need padding (masked mean exercised),
    # (b) already aligned (pure fast path).  Both get >=2 grid steps.
    cases = [(20, 6), (16, 8)]
    for idx, (B, N) in enumerate(cases):
        ks, ki, kh = jax.random.split(jax.random.fold_in(k_data, idx), 3)
        state = jax.random.normal(ks, (B, N, state_embedding), jnp.float32)
        instruction = jax.random.normal(ki, (B, instruction_embedding), jnp.float32)
        hidden_state = jax.random.normal(kh, (B, hidden_state_size), jnp.float32)

        out = double_att_deepset(state, instruction, hidden_state, prepared)
        out = jax.block_until_ready(out)

        ref = reference_forward(state, instruction, hidden_state, params)
        assert out.shape == (B, output_size), out.shape
        # bf16 matmul operands (f32 accumulation) -> loosened tolerance.
        assert jnp.allclose(out, ref, atol=1e-2, rtol=1e-2), (
            float(jnp.max(jnp.abs(out - ref))))

    print("KERNEL_OK")
</pallas_src>

<mosaic_0001>
module attributes {stable_mosaic.version = 11 : i64} {
  func.func @_double_att_deepset_kernel(%arg0: i32, %arg1: memref<16x48xf32, #tpu.memory_space<vmem>>, %arg2: memref<16x8x16xf32, #tpu.memory_space<vmem>>, %arg3: memref<48x32xf32, #tpu.memory_space<vmem>>, %arg4: memref<1x32xf32, #tpu.memory_space<vmem>>, %arg5: memref<16x128xbf16, #tpu.memory_space<vmem>>, %arg6: memref<1x128xf32, #tpu.memory_space<vmem>>, %arg7: memref<128x128xbf16, #tpu.memory_space<vmem>>, %arg8: memref<1x128xf32, #tpu.memory_space<vmem>>, %arg9: memref<16x128xf32, #tpu.memory_space<vmem>>) attributes {dimension_semantics = [#tpu.dimension_semantics<parallel>], iteration_bounds = array<i64: 2>, scalar_prefetch = 0 : i64, scratch_operands = 0 : i64, tpu.core_type = #tpu.core_type<tc>, window_params = [{transform_indices = @transform_0, window_bounds = array<i64: 16, 48>}, {transform_indices = @transform_1, window_bounds = array<i64: 16, 8, 16>}, {pipeline_mode = #tpu.pipeline_mode<synchronous>, transform_indices = @transform_2, window_bounds = array<i64: 48, 32>}, {pipeline_mode = #tpu.pipeline_mode<synchronous>, transform_indices = @transform_3, window_bounds = array<i64: 1, 32>}, {pipeline_mode = #tpu.pipeline_mode<synchronous>, transform_indices = @transform_4, window_bounds = array<i64: 16, 128>}, {pipeline_mode = #tpu.pipeline_mode<synchronous>, transform_indices = @transform_5, window_bounds = array<i64: 1, 128>}, {pipeline_mode = #tpu.pipeline_mode<synchronous>, transform_indices = @transform_6, window_bounds = array<i64: 128, 128>}, {pipeline_mode = #tpu.pipeline_mode<synchronous>, transform_indices = @transform_7, window_bounds = array<i64: 1, 128>}, {transform_indices = @transform_8, window_bounds = array<i64: 16, 128>}]} {
    %c0 = arith.constant 0 : index
    %c0_0 = arith.constant 0 : index
    %0 = vector.load %arg1[%c0, %c0_0] : memref<16x48xf32, #tpu.memory_space<vmem>>, vector<16x48xf32>
    %c0_1 = arith.constant 0 : index
    %c0_2 = arith.constant 0 : index
    %1 = vector.load %arg3[%c0_1, %c0_2] : memref<48x32xf32, #tpu.memory_space<vmem>>, vector<48x32xf32>
    %cst = arith.constant dense<0.000000e+00> : vector<16x32xf32>
    %2 = tpu.matmul %0, %1, %cst {dimension_numbers = #tpu.dot_dimension_numbers<[1], [0], [0], [1], [0, 0, 1, 1], [], []>} : vector<16x48xf32>, vector<48x32xf32>, vector<16x32xf32> -> vector<16x32xf32>
    %c0_3 = arith.constant 0 : index
    %c0_4 = arith.constant 0 : index
    %3 = vector.load %arg4[%c0_3, %c0_4] : memref<1x32xf32, #tpu.memory_space<vmem>>, vector<1x32xf32>
    %4 = vector.broadcast %3 : vector<1x32xf32> to vector<16x32xf32>
    %5 = arith.addf %2, %4 : vector<16x32xf32>
    %6 = arith.negf %5 : vector<16x32xf32>
    %7 = math.exp %6 : vector<16x32xf32>
    %cst_5 = arith.constant 1.000000e+00 : f32
    %8 = vector.broadcast %cst_5 : f32 to vector<16x32xf32>
    %9 = arith.addf %8, %7 : vector<16x32xf32>
    %10 = arith.divf %8, %9 : vector<16x32xf32>
    %11 = vector.extract_strided_slice %10 {offsets = [0, 0], sizes = [16, 16], strides = [1, 1]} : vector<16x32xf32> to vector<16x16xf32>
    %12 = vector.extract_strided_slice %10 {offsets = [0, 16], sizes = [16, 16], strides = [1, 1]} : vector<16x32xf32> to vector<16x16xf32>
    %13 = arith.mulf %11, %12 : vector<16x16xf32>
    %c0_6 = arith.constant 0 : index
    %c0_7 = arith.constant 0 : index
    %c0_8 = arith.constant 0 : index
    %14 = vector.load %arg2[%c0_6, %c0_7, %c0_8] : memref<16x8x16xf32, #tpu.memory_space<vmem>>, vector<16x8x16xf32>
    %15 = vector.shape_cast %13 : vector<16x16xf32> to vector<16x1x16xf32>
    %16 = vector.broadcast %15 : vector<16x1x16xf32> to vector<16x8x16xf32>
    %17 = arith.mulf %16, %14 : vector<16x8x16xf32>
    %18 = vector.shape_cast %17 : vector<16x8x16xf32> to vector<128x16xf32>
    %19 = arith.truncf %18 : vector<128x16xf32> to vector<128x16xbf16>
    %c0_9 = arith.constant 0 : index
    %c0_10 = arith.constant 0 : index
    %20 = vector.load %arg5[%c0_9, %c0_10] : memref<16x128xbf16, #tpu.memory_space<vmem>>, vector<16x128xbf16>
    %cst_11 = arith.constant dense<0.000000e+00> : vector<128x128xf32>
    %21 = tpu.matmul %19, %20, %cst_11 {dimension_numbers = #tpu.dot_dimension_numbers<[1], [0], [0], [1], [0, 0, 1, 1], [], []>} : vector<128x16xbf16>, vector<16x128xbf16>, vector<128x128xf32> -> vector<128x128xf32>
    %c0_12 = arith.constant 0 : index
    %c0_13 = arith.constant 0 : index
    %22 = vector.load %arg6[%c0_12, %c0_13] : memref<1x128xf32, #tpu.memory_space<vmem>>, vector<1x128xf32>
    %23 = vector.broadcast %22 : vector<1x128xf32> to vector<128x128xf32>
    %24 = arith.addf %21, %23 : vector<128x128xf32>
    %cst_14 = arith.constant 0.000000e+00 : f32
    %25 = vector.broadcast %cst_14 : f32 to vector<128x128xf32>
    %26 = arith.maximumf %24, %25 : vector<128x128xf32>
    %27 = arith.truncf %26 : vector<128x128xf32> to vector<128x128xbf16>
    %c0_15 = arith.constant 0 : index
    %c0_16 = arith.constant 0 : index
    %28 = vector.load %arg7[%c0_15, %c0_16] : memref<128x128xbf16, #tpu.memory_space<vmem>>, vector<128x128xbf16>
    %cst_17 = arith.constant dense<0.000000e+00> : vector<128x128xf32>
    %29 = tpu.matmul %27, %28, %cst_17 {dimension_numbers = #tpu.dot_dimension_numbers<[1], [0], [0], [1], [0, 0, 1, 1], [], []>} : vector<128x128xbf16>, vector<128x128xbf16>, vector<128x128xf32> -> vector<128x128xf32>
    %c0_18 = arith.constant 0 : index
    %c0_19 = arith.constant 0 : index
    %30 = vector.load %arg8[%c0_18, %c0_19] : memref<1x128xf32, #tpu.memory_space<vmem>>, vector<1x128xf32>
    %31 = vector.broadcast %30 : vector<1x128xf32> to vector<128x128xf32>
    %32 = arith.addf %29, %31 : vector<128x128xf32>
    %33 = arith.negf %32 : vector<128x128xf32>
    %34 = math.exp %33 : vector<128x128xf32>
    %cst_20 = arith.constant 1.000000e+00 : f32
    %35 = vector.broadcast %cst_20 : f32 to vector<128x128xf32>
    %36 = arith.addf %35, %34 : vector<128x128xf32>
    %37 = arith.divf %35, %36 : vector<128x128xf32>
    %38 = vector.shape_cast %37 : vector<128x128xf32> to vector<16x8x128xf32>
    %39 = tpu.iota {dimensions = array<i32: 0>} : vector<8x128xi32>
    %c6_i32 = arith.constant 6 : i32
    %40 = vector.broadcast %c6_i32 : i32 to vector<8x128xi32>
    %41 = arith.cmpi slt, %39, %40 : vector<8x128xi32>
    %42 = arith.extui %41 : vector<8x128xi1> to vector<8x128xi32>
    %43 = arith.sitofp %42 : vector<8x128xi32> to vector<8x128xf32>
    %44 = vector.shape_cast %43 : vector<8x128xf32> to vector<1x8x128xf32>
    %45 = vector.broadcast %44 : vector<1x8x128xf32> to vector<16x8x128xf32>
    %46 = arith.mulf %38, %45 : vector<16x8x128xf32>
    %cst_21 = arith.constant dense<0.000000e+00> : vector<16x128xf32>
    %47 = vector.multi_reduction <add>, %46, %cst_21 [1] : vector<16x8x128xf32> to vector<16x128xf32>
    %cst_22 = arith.constant 0.166666672 : f32
    %48 = vector.broadcast %cst_22 : f32 to vector<16x128xf32>
    %49 = arith.mulf %47, %48 : vector<16x128xf32>
    %c0_23 = arith.constant 0 : index
    %c0_24 = arith.constant 0 : index
    %50 = vector.load %arg9[%c0_23, %c0_24] : memref<16x128xf32, #tpu.memory_space<vmem>>, vector<16x128xf32>
    tpu.vector_store %arg9[%c0_23, %c0_24], %49 {strides = array<i32>} : memref<16x128xf32, #tpu.memory_space<vmem>>, vector<16x128xf32>,
    return
  }
  func.func @transform_0(%arg0: i32) -> (i32, i32) {
    %c0_i32 = arith.constant 0 : i32
    %c0_i32_0 = arith.constant 0 : i32
    return %arg0, %c0_i32 : i32, i32
  }
  func.func @transform_1(%arg0: i32) -> (i32, i32, i32) {
    %c0_i32 = arith.constant 0 : i32
    %c0_i32_0 = arith.constant 0 : i32
    %c0_i32_1 = arith.constant 0 : i32
    return %arg0, %c0_i32, %c0_i32_0 : i32, i32, i32
  }
  func.func @transform_2(%arg0: i32) -> (i32, i32) {
    %c0_i32 = arith.constant 0 : i32
    %c0_i32_0 = arith.constant 0 : i32
    %c0_i32_1 = arith.constant 0 : i32
    return %c0_i32, %c0_i32_0 : i32, i32
  }
  func.func @transform_3(%arg0: i32) -> (i32, i32) {
    %c0_i32 = arith.constant 0 : i32
    %c0_i32_0 = arith.constant 0 : i32
    %c0_i32_1 = arith.constant 0 : i32
    return %c0_i32, %c0_i32_0 : i32, i32
  }
  func.func @transform_4(%arg0: i32) -> (i32, i32) {
    %c0_i32 = arith.constant 0 : i32
    %c0_i32_0 = arith.constant 0 : i32
    %c0_i32_1 = arith.constant 0 : i32
    return %c0_i32, %c0_i32_0 : i32, i32
  }
  func.func @transform_5(%arg0: i32) -> (i32, i32) {
    %c0_i32 = arith.constant 0 : i32
    %c0_i32_0 = arith.constant 0 : i32
    %c0_i32_1 = arith.constant 0 : i32
    return %c0_i32, %c0_i32_0 : i32, i32
  }
  func.func @transform_6(%arg0: i32) -> (i32, i32) {
    %c0_i32 = arith.constant 0 : i32
    %c0_i32_0 = arith.constant 0 : i32
    %c0_i32_1 = arith.constant 0 : i32
    return %c0_i32, %c0_i32_0 : i32, i32
  }
  func.func @transform_7(%arg0: i32) -> (i32, i32) {
    %c0_i32 = arith.constant 0 : i32
    %c0_i32_0 = arith.constant 0 : i32
    %c0_i32_1 = arith.constant 0 : i32
    return %c0_i32, %c0_i32_0 : i32, i32
  }
  func.func @transform_8(%arg0: i32) -> (i32, i32) {
    %c0_i32 = arith.constant 0 : i32
    %c0_i32_0 = arith.constant 0 : i32
    return %arg0, %c0_i32 : i32, i32
  }
}

</mosaic_0001>

<bundles_post_ra>
// kernel: tpu_custom_call.1
= control target key start
LH: loop header
LB: loop body
LE: loop exit
PB: predicated region body
PF: predicated region fallthrough
CT: control target
= control target key end

     0   :  { %13 = vsyncpa [#allocation3], 0  ;;  %s2074_s0 = inlined_call_operand.vmem [shape: f32[32,48], index: 0, kind: input, shape index: {}]   ;;  %s2075_s1 = inlined_call_operand.vmem [shape: f32[32,8,16], index: 1, kind: input, shape index: {}]   ;;  %s2076_s2 = inlined_call_operand.vmem [shape: f32[48,32], index: 2, kind: input, shape index: {}]   ;;  %s2077_s3 = inlined_call_operand.vmem [shape: f32[1,32], index: 3, kind: input, shape index: {}]   ;;  %s2078_s4 = inlined_call_operand.vmem [shape: bf16[16,128], index: 4, kind: input, shape index: {}]   ;;  %s2079_s5 = inlined_call_operand.vmem [shape: f32[1,128], index: 5, kind: input, shape index: {}]   ;;  %s2080_s6 = inlined_call_operand.vmem [shape: bf16[128,128], index: 6, kind: input, shape index: {}]   ;;  %s2081_s7 = inlined_call_operand.vmem [shape: f32[1,128], index: 7, kind: input, shape index: {}]   ;;  %s2082_s8 = inlined_call_operand.hbm [shape: f32[32,128], index: 8, kind: output, shape index: {}]  }
   0x1   :  { %15 = vsyncpa [#allocation3 + $0x1], 0  ;;  %s1764_s27 = smov 0   ;;  %s1766_s28 = smov 0  }
   0x2   :  { %s1768_s29 = smov 0   ;;  %s1770_s30 = smov 0  }
   0x3 LB: > { %s1785_s9 = sadd.s32 4294967295, %s1711_s30   ;;  %s1356_s10 = sadd.s32 4294967294, %s1711_s30   ;;  %s1711_s30 = sphi %s1770_s30, %s2088_s30   ;;  %s1707_s29 = sphi %s1768_s29, %s2087_s29   ;;  %s1703_s28 = sphi %s1766_s28, %s2086_s28   ;;  %s1699_s27 = sphi %s1764_s27, %s2085_s27  }
   0x4   : > { %s1789_s11 = sadd.s32 1, %s1711_s30   ;;  %s206_s12 = sadd.s32 1, %s1707_s29 }
   0x5   : > { %s203_s13 = ssub.s32 %s1711_s30, %s1789_s11  ;;  %p216_p0 = scmp.ne.s32.totalorder %s1707_s29, %s1703_s28 }
   0x6   : > { %p204_p1 = scmp.eq.s32.totalorder %s203_s13, 0  ;;  %p217_p2 = scmp.eq.s32.totalorder %s1785_s9, 1 }
   0x7   : > { %p222_p3 = scmp.ne.s32.totalorder %s1703_s28, %s1699_s27  ;;  %p223_p4 = scmp.eq.s32.totalorder %s1356_s10, 1 }
   0x8   : > { %s1800_s14 = scalar_select %p204_p1, %s1707_s29, %s206_s12  }
   0x9   : > { %p1802_p5 = por %p217_p2, %p216_p0  ;;  %p1806_p6 = por %p223_p4, %p222_p3 }
   0xa   : > { %p1359_p7 = scmp.ge.s32.totalorder %s1711_s30, 1  ;;  %p277_p8 = scmp.lt.s32.totalorder %s1711_s30, 3 }
   0xc   : > { %p278_p9 = pnand %p1359_p7, %p277_p8 }
   0xd   : > { %s1361_s21 = sshll.u32 (!%p278_p9), %s1785_s9, 1  ;;  %s1713_s23 = smov (!%p278_p9), 112  }
   0xe   : > { %281 = sbr.rel (%p278_p9) target bundleno = 890 (0x37a), region = 52  ;;  %p317_p10 = scmp.lt.s32.totalorder (!%p278_p9), %s1361_s21, 3 }
   0xf   : > { %s313_s25 = sand.u32 (!%p278_p9), 1, %s1703_s28  }
  0x10   : > { %s1360_s26 = sshll.u32 (!%p278_p9), %s313_s25, 4 }
  0x13   : > { %v337_v0 = vld [vmem:[%s2076_s2 + $0x28] sm:$0xff]  ;;  %v336_v1 = vld [vmem:[%s2076_s2 + $0x20] sm:$0xff]  ;;  %v335_v2 = vld [vmem:[%s2076_s2 + $0x18] sm:$0xff]  ;;  %vm345_vm0 = vcmask 392192   ;;  %s2090_s21 = smov (!%p317_p10, %s1361_s21), 3  ;;  %v471_v29 = vlaneseq  ;;  %vm684_vm1 = vcmask 130048  }
  0x14   : > { %1445 = vmatprep.subr.mxu0 %v337_v0  ;;  %v334_v3 = vld [vmem:[%s2076_s2 + $0x10] sm:$0xff]  ;;  %v333_v4 = vld [vmem:[%s2076_s2 + $0x8] sm:$0xff]  ;;  %s1362_s12 = sshll.u32 %s2090_s21, 3  ;;  %v332_v5 = vld [vmem:[%s2076_s2] sm:$0xff]  ;;  %v1714_v27 = vmov 1966171168  }
  0x15   : > { %1446 = vmatpush3.msra.mxu0 %v337_v0  ;;  %s320_s18 = scalar_lea.vmem %s2074_s0, %s1362_s12  ;;  %v1365_v8 = vld [vmem:[%s2077_s3] ss:$0 sm:$0xff]  ;;  %v1845_v22 = vld [vmem:[%s2080_s6 + $0x38] sm:$0xff]   ;;  %v1851_v23 = vld [vmem:[%s2080_s6 + $0x30] sm:$0xff]   ;;  %v469_v28 = vunpack.c.l.s4 %v1714_v27  ;;  %v1879_v31 = vshrl.u32 %v471_v29, 7  ;;  %vm1243_vm3 = vcmask 1041409  }
  0x16   : > { %1447 = vmatprep.subr.mxu0 %v336_v1  ;;  %v330_v6 = vld [vmem:[%s320_s18] sm:$0xff]  ;;  %v331_v7 = vld [vmem:[%s320_s18 + $0x8] sm:$0xff]  ;;  %1510 = vmatprep.subr.bf16.mxu1 %v1845_v22  ;;  %v1873_v26 = vld [vmem:[%s2080_s6 + $0x18] sm:$0xff]   ;;  %vm1245_vm4 = vcmask 1042434   ;;  %vm1247_vm5 = vcmask 1043459   ;;  %vm1249_vm6 = vcmask 1044484  }
  0x17   : > { %1448 = vmatpush3.msra.mxu0 %v336_v1  ;;  %1457 = vmatprep.mubr.msk.f32.mxu0 %vm345_vm0, %v330_v6  ;;  %v1570_v20 = vld [vmem:[%s2078_s4] sm:$0xff]   ;;  %v1859_v24 = vld [vmem:[%s2080_s6 + $0x28] sm:$0xff]   ;;  %v470_v30 = vunpack.c.0.s8 %v469_v28  ;;  %v1886_v37 = vsub.s32 0, %v1879_v31  ;;  %vm1096_vm2 = vcmp.lt.s32.totalorder %v1879_v31, 6  ;;  %vm1251_vm7 = vcmask 1045509   ;;  %s1411_s12 = sshll.u32 %s1785_s9, 8 }
  0x18   : > { %1449 = vmatprep.subr.mxu0 %v335_v2  ;;  %1518 = vmatpush3.bf16.msra.mxu1 %v1845_v22  ;;  %v1866_v25 = vld [vmem:[%s2080_s6 + $0x20] sm:$0xff]   ;;  %vm1253_vm8 = vcmask 1046534   ;;  %vm1255_vm9 = vcmask 1047559   ;;  %s2026_s19 = scalar_lea.hbm %s2082_s8, %s1411_s12  ;;  %s1716_s21 = smov [#allocation2]  }
  0x19   : > { %1450 = vmatpush3.msra.mxu0 %v335_v2  ;;  %1511 = vmatprep.subr.bf16.mxu1 %v1851_v23  ;;  %v1882_v32 = vsub.s32 %v470_v30, %v1879_v31  ;;  %s1655_s22 = sshll.u32 %s1716_s21, 4  ;;  %s1656_s22 = int_to_ptr.vmem [resolvable:$false] %s1655_s22 }
  0x1a   : > { %1451 = vmatprep.subr.mxu0 %v334_v3 }
  0x1b   : > { %1452 = vmatpush3.msra.mxu0 %v334_v3 }
  0x1c   : > { %1453 = vmatprep.subr.mxu0 %v333_v4  ;;  %1519 = vmatpush3.bf16.msra.mxu1 %v1851_v23 }
  0x1d   : > { %1454 = vmatpush3.msra.mxu0 %v333_v4  ;;  %1512 = vmatprep.subr.bf16.mxu1 %v1859_v24 }
  0x1e   : > { %1455 = vmatprep.subr.mxu0 %v332_v5 }
  0x1f   : > { %1456 = vmatpush3.msra.mxu0 %v332_v5 }
  0x20   : > { %1458 = vmatmul.mubr.msk.f32.vlgmr.msra.gmra.mxu0 %vm345_vm0, %v331_v7  ;;  %1460 = vmatprep.subr.bf16.mxu0 %v1570_v20 }
  0x21   : > { %1461 = vmatpush3.bf16.msra.mxu0 %v1570_v20  ;;  %1520 = vmatpush3.bf16.msra.mxu1 %v1859_v24 }
  0x22   : > { %1478 = vmatprep.subr.bf16.mxu0 %v1845_v22  ;;  %1513 = vmatprep.subr.bf16.mxu1 %v1866_v25 }
  0x25   : > { %1521 = vmatpush3.bf16.msra.mxu1 %v1866_v25 }
  0x26   : > { %1514 = vmatprep.subr.bf16.mxu1 %v1873_v26 }
  0x29   : > { %1522 = vmatpush3.bf16.msra.mxu1 %v1873_v26 }
  0xe0   : > { %v1459_v9 = vpop.f32.mrf.mxu0 }
  0xe1   : > { %v424_v10 = vadd.f32 %v1459_v9, %v1365_v8 }
  0xe2   : > { %v418_v11 = vpop.f32.mrf.mxu0 }
  0xe3   : > { %v1369_v12 = vmul.f32 -1.442695, %v424_v10  ;;  %v419_v13 = vadd.f32 %v1365_v8, %v418_v11 }
  0xe5   : > { %v1368_v14 = vmul.f32 -1.442695, %v419_v13  ;;  %1579 = vpow2.f32 %v1369_v12 }
  0xe7   : > { %1581 = vpow2.f32 %v1368_v14 }
  0xf2   : > { %v1580_v15 = vpop.eup %1579 }
  0xf3   : > { %v434_v18 = vadd.f32 1.0, %v1580_v15 }
  0xf4   : > { %v1582_v16 = vpop.eup %1581 }
  0xf5   : > { %v433_v17 = vadd.f32 1.0, %v1582_v16 }
  0xf7   : > { %1583 = vrcp.f32 %v433_v17 }
  0xf8   : > { %1585 = vrcp.f32 %v434_v18 }
 0x104   : > { %v1584_v19 = vpop.eup %1583 }
 0x105   : > { %441 = vrot.lane.b32.xlu0 %v1584_v19, %s1713_s23  ;;  %v1586_v21 = vpop.eup %1585 }
 0x109   : > { %443 = vrot.lane.b32.xlu0 %v1586_v21, %s1713_s23  ;;  %s1363_s23 = sshll.u32 %s1785_s9, 4  ;;  %s2034_s9 = scalar_lea.sflag [#allocation3], %s313_s25 }
 0x10a   : > { %p323_p11 = scmp.lt.s32.totalorder %s1363_s23, 31 }
 0x10c   : > { %s2092_s23 = smov (!%p323_p11, %s1363_s23), 31 }
 0x10d   : > { %s1364_s24 = sshll.u32 %s2092_s23, 3  ;;  %s1657_s23 = scalar_lea.vmem %s1656_s22, 512 }
 0x10e   : > { %s1893_s10 = scalar_lea.vmem %s2075_s1, %s1364_s24 }
 0x10f   : > { %v449_v50 = vld [vmem:[%s1893_s10] sm:$0xff]  ;;  %v451_v54 = vld [vmem:[%s1893_s10 + $0x10] sm:$0xff]  ;;  %v452_v55 = vld [vmem:[%s1893_s10 + $0x18] sm:$0xff] }
 0x110   : > { %v450_v57 = vld [vmem:[%s1893_s10 + $0x8] sm:$0xff]  ;;  %v453_v6 = vld [vmem:[%s1893_s10 + $0x20] sm:$0xff]  ;;  %v456_v15 = vld [vmem:[%s1893_s10 + $0x38] sm:$0xff] }
 0x111   : > { %v454_v7 = vld [vmem:[%s1893_s10 + $0x28] sm:$0xff]  ;;  %v457_v27 = vld [vmem:[%s1893_s10 + $0x40] sm:$0xff] }
 0x112   : > { %v458_v18 = vld [vmem:[%s1893_s10 + $0x48] sm:$0xff] }
 0x177   : > { %v442_v33 = vpop.permute.xlu0 %441 }
 0x178   : > { %v447_v34 = vmul.f32 %v1584_v19, %v442_v33 }
 0x17a   : > { %v467_v35 = vcombine.high %v447_v34, %v447_v34  ;;  %v474_v36 = vrot.slane %v447_v34, %v1882_v32 }
 0x17b   : > { %v444_v38 = vpop.permute.xlu0 %443 }
 0x17c   : > { %v481_v39 = vrot.slane %v467_v35, %v1882_v32  ;;  %v482_v40 = vcombine.high %v474_v36, %v474_v36  ;;  %v490_v41 = vrot.slane %v474_v36, %v1882_v32  ;;  %v448_v42 = vmul.f32 %v1586_v21, %v444_v38  ;;  %v455_v21 = vld [vmem:[%s1893_s10 + $0x30] sm:$0xff] }
 0x17e   : > { %v483_v43 = vcombine.high %v481_v39, %v481_v39  ;;  %v504_v44 = vrot.slane %v482_v40, %v1882_v32  ;;  %v512_v45 = vcombine.high %v490_v41, %v490_v41  ;;  %v497_v46 = vrot.slane %v481_v39, %v1882_v32 }
 0x17f   : > { %v568_v47 = vrot.slane %v490_v41, %v1886_v37  ;;  %v516_v48 = vcombine.high %v448_v42, %v448_v42  ;;  %v523_v49 = vrot.slane %v448_v42, %v1882_v32  ;;  %v460_v42 = vld [vmem:[%s1893_s10 + $0x58] sm:$0xff] }
 0x180   : > { %v511_v51 = vrot.slane %v483_v43, %v1882_v32  ;;  %v514_v52 = vcombine.high %v504_v44, %v504_v44  ;;  %v572_v53 = vrot.slane %v504_v44, %v1886_v37  ;;  %v576_v56 = vrot.slane %v512_v45, %v1886_v37  ;;  %v462_v44 = vld [vmem:[%s1893_s10 + $0x68] sm:$0xff] }
 0x181   : > { %v584_v59 = vrot.slane %v497_v46, %v1886_v37  ;;  %v645_v60 = vmul.f32 %v568_v47, %v449_v50  ;;  %v530_v61 = vrot.slane %v516_v48, %v1882_v32  ;;  %v531_v62 = vcombine.high %v523_v49, %v523_v49  ;;  %v461_v47 = vld [vmem:[%s1893_s10 + $0x60] sm:$0xff] }
 0x182   : > { %v580_v58 = vrot.slane %v514_v52, %v1886_v37  ;;  %v588_v63 = vrot.slane %v511_v51, %v1886_v37  ;;  %v647_v0 = vmul.f32 %v576_v56, %v451_v54  ;;  %v646_v2 = vmul.f32 %v572_v53, %v450_v57  ;;  %v463_v56 = vld [vmem:[%s1893_s10 + $0x70] sm:$0xff] }
 0x183   : > { %v513_v3 = vcombine.high %v497_v46, %v497_v46  ;;  %v515_v4 = vcombine.high %v511_v51, %v511_v51  ;;  %v553_v5 = vrot.slane %v531_v62, %v1882_v32  ;;  %v539_v8 = vrot.slane %v523_v49, %v1882_v32  ;;  %v1370_v62 = vld [vmem:[%s2079_s5] ss:$0 sm:$0xff] }
 0x184   : > { %v648_v1 = vmul.f32 %v580_v58, %v452_v55  ;;  %v661_v9 = vpack.c.bf16 %v646_v2, %v645_v60  ;;  %v532_v11 = vcombine.high %v530_v61, %v530_v61  ;;  %v649_v13 = vmul.f32 %v584_v59, %v453_v6  ;;  %v464_v55 = vld [vmem:[%s1893_s10 + $0x78] sm:$0xff] }
 0x185   : > { %v604_v12 = vrot.slane %v553_v5, %v1886_v37  ;;  %v650_v14 = vmul.f32 %v588_v63, %v454_v7  ;;  %v592_v16 = vrot.slane %v513_v3, %v1886_v37  ;;  %v596_v17 = vrot.slane %v515_v4, %v1886_v37 }
 0x186   : > { %v662_v10 = vpack.c.bf16 %v648_v1, %v647_v0  ;;  %1462 = vmatprep.mubr.msk.bf16.mxu0 %vm684_vm1, %v661_v9  ;;  %v600_v19 = vrot.slane %v539_v8, %v1886_v37  ;;  %v563_v28 = vcombine.high %v553_v5, %v553_v5  ;;  %v560_v30 = vrot.slane %v532_v11, %v1882_v32 }
 0x187   : > { %v663_v20 = vpack.c.bf16 %v650_v14, %v649_v13  ;;  %v652_v29 = vmul.f32 %v596_v17, %v456_v15  ;;  %v654_v33 = vmul.f32 %v604_v12, %v458_v18  ;;  %v561_v34 = vcombine.high %v539_v8, %v539_v8 }
 0x188   : > { %1463 = vmatmul.mubr.msk.bf16.vlgmr.msra.gmra.mxu0 %vm684_vm1, %v662_v10  ;;  %v651_v35 = vmul.f32 %v592_v16, %v455_v21  ;;  %v546_v36 = vrot.slane %v530_v61, %v1882_v32  ;;  %v653_v38 = vmul.f32 %v600_v19, %v457_v27  ;;  %v620_v40 = vrot.slane %v560_v30, %v1886_v37 }
 0x189   : > { %1479 = vmatpush3.bf16.msra.mxu0 %v1845_v22  ;;  %1466 = vmatprep.mubr.msk.bf16.mxu0 %vm684_vm1, %v663_v20  ;;  %v612_v22 = vrot.slane %v563_v28, %v1886_v37  ;;  %v608_v43 = vrot.slane %v561_v34, %v1886_v37  ;;  %v564_v45 = vcombine.high %v560_v30, %v560_v30 }
 0x18a   : > { %1480 = vmatprep.subr.bf16.mxu0 %v1851_v23  ;;  %v664_v39 = vpack.c.bf16 %v652_v29, %v651_v35  ;;  %v665_v41 = vpack.c.bf16 %v654_v33, %v653_v38  ;;  %v616_v32 = vrot.slane %v546_v36, %v1886_v37  ;;  %v658_v48 = vmul.f32 %v620_v40, %v462_v44 }
 0x18b   : > { %v656_v46 = vmul.f32 %v612_v22, %v460_v42  ;;  %v562_v49 = vcombine.high %v546_v36, %v546_v36  ;;  %v628_v53 = vrot.slane %v564_v45, %v1886_v37 }
 0x18c   : > { %v657_v51 = vmul.f32 %v616_v32, %v461_v47 }
 0x18d   : > { %1481 = vmatpush3.bf16.msra.mxu0 %v1851_v23  ;;  %v459_v23 = vld [vmem:[%s1893_s10 + $0x50] sm:$0xff]  ;;  %v660_v57 = vmul.f32 %v628_v53, %v464_v55  ;;  %s315_s10 = scalar_lea.vmem [#allocation2], %s1360_s26 }
 0x18e   : > { %1482 = vmatprep.subr.bf16.mxu0 %v1859_v24  ;;  %v655_v50 = vmul.f32 %v608_v43, %v459_v23  ;;  %v667_v54 = vpack.c.bf16 %v658_v48, %v657_v51  ;;  %s1282_s13 = sshll.u32 %s315_s10, 4  ;;  %s2028_s13 = int_to_ptr.vmem [resolvable:$true] %s1282_s13 }
 0x18f   : > { %s1651_s20 = scalar_lea.vmem %s2028_s13, 256  ;;  %p1658_p1 = scmp.lt.s32.totalorder %s2028_s13, %s1656_s22 }
 0x190   : > { %1467 = vmatmul.mubr.msk.bf16.gmra.mxu0 %vm684_vm1, %v664_v39  ;;  %v666_v52 = vpack.c.bf16 %v656_v46, %v655_v50  ;;  %p1652_p12 = scmp.ne.s32.totalorder %s2028_s13, %s1651_s20  ;;  %p1659_p2 = scmp.lt.s32.totalorder %s1657_s23, %s1651_s20 }
 0x191   : > { %1470 = vmatprep.mubr.msk.bf16.mxu0 %vm684_vm1, %v665_v41  ;;  %1483 = vmatpush3.bf16.msra.mxu0 %v1859_v24  ;;  %v624_v24 = vrot.slane %v562_v49, %v1886_v37  ;;  %v1577_v37 = vld [vmem:[%s2080_s6 + $0x8] sm:$0xff]  }
 0x192   : > { %1484 = vmatprep.subr.bf16.mxu0 %v1866_v25  ;;  %p1653_p13 = pnand %p1652_p12, %p1802_p5  ;;  %p1660_p3 = por %p1659_p2, %p1658_p1 }
 0x193   : > { %v659_v58 = vmul.f32 %v624_v24, %v463_v56 }
 0x194   : > { %p1654_p0 = pneg %p1653_p13 }
 0x195   : > { %1485 = vmatpush3.bf16.msra.mxu0 %v1866_v25  ;;  %v668_v59 = vpack.c.bf16 %v660_v57, %v659_v58  ;;  %v1576_v25 = vld [vmem:[%s2080_s6 + $0x10] sm:$0xff]   ;;  %v1968_v57 = vld [vmem:[%s2081_s7] ss:$0 sm:$0xff] }
 0x196   : > { %1486 = vmatprep.subr.bf16.mxu0 %v1873_v26  ;;  %1515 = vmatprep.subr.bf16.mxu1 %v1576_v25  ;;  %p1661_p4 = pnand %p1660_p3, %p1654_p0 }
 0x197   : > { %1523 = vmatpush3.bf16.msra.mxu1 %v1576_v25 }
 0x198   : > { %1471 = vmatmul.mubr.msk.bf16.gmra.mxu0 %vm684_vm1, %v666_v52  ;;  %1516 = vmatprep.subr.bf16.mxu1 %v1577_v37 }
 0x199   : > { %1474 = vmatprep.mubr.msk.bf16.mxu0 %vm684_vm1, %v667_v54  ;;  %1487 = vmatpush3.bf16.msra.mxu0 %v1873_v26  ;;  %v1578_v26 = vld [vmem:[%s2080_s6] sm:$0xff]  }
 0x19a   : > { %1488 = vmatprep.subr.bf16.mxu0 %v1576_v25 }
 0x19b   : > { %1524 = vmatpush3.bf16.msra.mxu1 %v1577_v37 }
 0x19c   : > { %1517 = vmatprep.subr.bf16.mxu1 %v1578_v26 }
 0x19d   : > { %1489 = vmatpush3.bf16.msra.mxu0 %v1576_v25 }
 0x19e   : > { %1490 = vmatprep.subr.bf16.mxu0 %v1577_v37 }
 0x19f   : > { %1525 = vmatpush3.bf16.msra.mxu1 %v1578_v26 }
 0x1a0   : > { %1475 = vmatmul.mubr.msk.bf16.gmra.mxu0 %vm684_vm1, %v668_v59 }
 0x1a1   : > { %1491 = vmatpush3.bf16.msra.mxu0 %v1577_v37 }
 0x1a2   : > { %1492 = vmatprep.subr.bf16.mxu0 %v1578_v26 }
 0x1a5   : > { %1493 = vmatpush3.bf16.msra.mxu0 %v1578_v26 }
 0x248   : > { %v1464_v60 = vpop.f32.mrf.mxu0 }
 0x249   : > { %v752_v2 = vadd.f32 %v1464_v60, %v1370_v62 }
 0x24a   : > { %v743_v61 = vpop.f32.mrf.mxu0 }
 0x24b   : > { %v744_v0 = vadd.f32 %v1370_v62, %v743_v61  ;;  %v808_v9 = vmax.f32 %v752_v2, 0.0 }
 0x24c   : > { %v1465_v63 = vpop.f32.mrf.mxu0 }
 0x24d   : > { %v755_v1 = vadd.f32 %v1465_v63, %v1370_v62  ;;  %v806_v7 = vmax.f32 %v744_v0, 0.0 }
 0x24e   : > { %v746_v3 = vpop.f32.mrf.mxu0 }
 0x24f   : > { %v747_v4 = vadd.f32 %v1370_v62, %v746_v3  ;;  %v809_v5 = vmax.f32 %v755_v1, 0.0 }
 0x250   : > { %v1468_v6 = vpop.f32.mrf.mxu0 }
 0x251   : > { %v807_v8 = vmax.f32 %v747_v4, 0.0  ;;  %v823_v12 = vpack.c.bf16 %v809_v5, %v808_v9  ;;  %v768_v16 = vadd.f32 %v1468_v6, %v1370_v62 }
 0x252   : > { %v759_v10 = vpop.f32.mrf.mxu0 }
 0x253   : > { %v822_v11 = vpack.c.bf16 %v807_v8, %v806_v7  ;;  %v760_v14 = vadd.f32 %v1370_v62, %v759_v10  ;;  %v812_v28 = vmax.f32 %v768_v16, 0.0 }
 0x254   : > { %v1469_v13 = vpop.f32.mrf.mxu0 }
 0x255   : > { %v771_v15 = vadd.f32 %v1469_v13, %v1370_v62  ;;  %1494 = vmatprep.mubr.bf16.mxu0 %v822_v11  ;;  %v810_v21 = vmax.f32 %v760_v14, 0.0 }
 0x256   : > { %v762_v17 = vpop.f32.mrf.mxu0  ;;  %1495 = vmatmul.mubr.bf16.vlgmr.msra.gmra.mxu0 %v823_v12 }
 0x257   : > { %v763_v18 = vadd.f32 %v1370_v62, %v762_v17  ;;  %v813_v19 = vmax.f32 %v771_v15, 0.0 }
 0x258   : > { %v1472_v20 = vpop.f32.mrf.mxu0 }
 0x259   : > { %v811_v27 = vmax.f32 %v763_v18, 0.0  ;;  %v825_v33 = vpack.c.bf16 %v813_v19, %v812_v28  ;;  %v784_v38 = vadd.f32 %v1472_v20, %v1370_v62 }
 0x25a   : > { %v775_v29 = vpop.f32.mrf.mxu0 }
 0x25b   : > { %v824_v30 = vpack.c.bf16 %v811_v27, %v810_v21  ;;  %v776_v35 = vadd.f32 %v1370_v62, %v775_v29  ;;  %v816_v44 = vmax.f32 %v784_v38, 0.0 }
 0x25c   : > { %v1473_v34 = vpop.f32.mrf.mxu0 }
 0x25d   : > { %v787_v36 = vadd.f32 %v1473_v34, %v1370_v62  ;;  %1498 = vmatprep.mubr.bf16.mxu1 %v824_v30  ;;  %v814_v42 = vmax.f32 %v776_v35, 0.0 }
 0x25e   : > { %v778_v22 = vpop.f32.mrf.mxu0  ;;  %1499 = vmatmul.mubr.bf16.vlgmr.msra.gmra.mxu1 %v825_v33 }
 0x25f   : > { %v779_v39 = vadd.f32 %v1370_v62, %v778_v22  ;;  %v817_v40 = vmax.f32 %v787_v36, 0.0 }
 0x260   : > { %v1476_v41 = vpop.f32.mrf.mxu0 }
 0x261   : > { %v815_v43 = vmax.f32 %v779_v39, 0.0  ;;  %v827_v45 = vpack.c.bf16 %v817_v40, %v816_v44  ;;  %v800_v49 = vadd.f32 %v1476_v41, %v1370_v62 }
 0x262   : > { %v791_v32 = vpop.f32.mrf.mxu0 }
 0x263   : > { %v826_v23 = vpack.c.bf16 %v815_v43, %v814_v42  ;;  %v792_v47 = vadd.f32 %v1370_v62, %v791_v32  ;;  %v820_v55 = vmax.f32 %v800_v49, 0.0 }
 0x264   : > { %v1477_v46 = vpop.f32.mrf.mxu0 }
 0x265   : > { %v803_v48 = vadd.f32 %v1477_v46, %v1370_v62  ;;  %1502 = vmatprep.mubr.bf16.mxu1 %v826_v23  ;;  %v818_v53 = vmax.f32 %v792_v47, 0.0 }
 0x266   : > { %v794_v50 = vpop.f32.mrf.mxu0  ;;  %1503 = vmatmul.mubr.bf16.gmra.mxu1 %v827_v45 }
 0x267   : > { %v795_v51 = vadd.f32 %v1370_v62, %v794_v50  ;;  %v821_v52 = vmax.f32 %v803_v48, 0.0 }
 0x269   : > { %v819_v54 = vmax.f32 %v795_v51, 0.0  ;;  %v829_v56 = vpack.c.bf16 %v821_v52, %v820_v55 }
 0x26b   : > { %v828_v24 = vpack.c.bf16 %v819_v54, %v818_v53 }
 0x26d   : > { %1506 = vmatprep.mubr.bf16.mxu1 %v828_v24 }
 0x26e   : > { %1507 = vmatmul.mubr.bf16.gmra.mxu1 %v829_v56 }
 0x316   : > { %v1496_v58 = vpop.f32.mrf.mxu0 }
 0x317   : > { %v944_v59 = vadd.f32 %v1496_v58, %v1968_v57  ;;  %v1715_v58 = vmov 0.0  }
 0x318   : > { %v935_v25 = vpop.f32.mrf.mxu0 }
 0x319   : > { %v1391_v37 = vmul.f32 -1.442695, %v944_v59  ;;  %v936_v26 = vadd.f32 %v1968_v57, %v935_v25  ;;  %v1989_v59 = vsel %vm1096_vm2, 1.0, %v1715_v58 }
 0x31a   : > { %v1497_v60 = vpop.f32.mrf.mxu0 }
 0x31b   : > { %1587 = vpow2.f32 %v1391_v37  ;;  %v1389_v61 = vmul.f32 -1.442695, %v936_v26  ;;  %v947_v62 = vadd.f32 %v1497_v60, %v1968_v57 }
 0x31c   : > { %v938_v63 = vpop.f32.mrf.mxu0 }
 0x31d   : > { %1589 = vpow2.f32 %v1389_v61  ;;  %v1392_v0 = vmul.f32 -1.442695, %v947_v62  ;;  %v939_v1 = vadd.f32 %v1968_v57, %v938_v63 }
 0x31e   : > { %v1500_v2 = vpop.f32.mrf.mxu1 }
 0x31f   : > { %1591 = vpow2.f32 %v1392_v0  ;;  %v1390_v3 = vmul.f32 -1.442695, %v939_v1  ;;  %v960_v4 = vadd.f32 %v1500_v2, %v1968_v57 }
 0x320   : > { %v951_v5 = vpop.f32.mrf.mxu1 }
 0x321   : > { %1593 = vpow2.f32 %v1390_v3  ;;  %v1395_v6 = vmul.f32 -1.442695, %v960_v4  ;;  %v952_v7 = vadd.f32 %v1968_v57, %v951_v5 }
 0x322   : > { %v1501_v8 = vpop.f32.mrf.mxu1 }
 0x323   : > { %1595 = vpow2.f32 %v1395_v6  ;;  %v1393_v9 = vmul.f32 -1.442695, %v952_v7  ;;  %v963_v10 = vadd.f32 %v1501_v8, %v1968_v57 }
 0x324   : > { %v954_v11 = vpop.f32.mrf.mxu1 }
 0x325   : > { %1597 = vpow2.f32 %v1393_v9  ;;  %v1396_v12 = vmul.f32 -1.442695, %v963_v10  ;;  %v955_v13 = vadd.f32 %v1968_v57, %v954_v11 }
 0x326   : > { %v1504_v14 = vpop.f32.mrf.mxu1 }
 0x327   : > { %1599 = vpow2.f32 %v1396_v12  ;;  %v1394_v15 = vmul.f32 -1.442695, %v955_v13  ;;  %v976_v16 = vadd.f32 %v1504_v14, %v1968_v57 }
 0x328   : > { %v1588_v17 = vpop.eup %1587  ;;  %v967_v18 = vpop.f32.mrf.mxu1 }
 0x329   : > { %v1048_v19 = vadd.f32 1.0, %v1588_v17  ;;  %1601 = vpow2.f32 %v1394_v15  ;;  %v1399_v20 = vmul.f32 -1.442695, %v976_v16  ;;  %v968_v21 = vadd.f32 %v1968_v57, %v967_v18 }
 0x32a   : > { %v1590_v27 = vpop.eup %1589  ;;  %v1505_v28 = vpop.f32.mrf.mxu1 }
 0x32b   : > { %1603 = vrcp.f32 %v1048_v19  ;;  %v1046_v29 = vadd.f32 1.0, %v1590_v27  ;;  %v1397_v30 = vmul.f32 -1.442695, %v968_v21  ;;  %v979_v33 = vadd.f32 %v1505_v28, %v1968_v57 }
 0x32c   : > { %v1592_v34 = vpop.eup %1591  ;;  %1605 = vpow2.f32 %v1399_v20  ;;  %v970_v35 = vpop.f32.mrf.mxu1 }
 0x32d   : > { %1607 = vrcp.f32 %v1046_v29  ;;  %v1049_v36 = vadd.f32 1.0, %v1592_v34  ;;  %v1400_v38 = vmul.f32 -1.442695, %v979_v33  ;;  %v971_v22 = vadd.f32 %v1968_v57, %v970_v35 }
 0x32e   : > { %v1594_v39 = vpop.eup %1593  ;;  %1609 = vpow2.f32 %v1397_v30  ;;  %v1508_v40 = vpop.f32.mrf.mxu1 }
 0x32f   : > { %1611 = vrcp.f32 %v1049_v36  ;;  %v1047_v41 = vadd.f32 1.0, %v1594_v39  ;;  %v1398_v42 = vmul.f32 -1.442695, %v971_v22  ;;  %v992_v43 = vadd.f32 %v1508_v40, %v1968_v57 }
 0x330   : > { %v1596_v44 = vpop.eup %1595  ;;  %1613 = vpow2.f32 %v1400_v38  ;;  %v983_v32 = vpop.f32.mrf.mxu1 }
 0x331   : > { %1615 = vrcp.f32 %v1047_v41  ;;  %v1052_v23 = vadd.f32 1.0, %v1596_v44  ;;  %v1403_v45 = vmul.f32 -1.442695, %v992_v43  ;;  %v984_v46 = vadd.f32 %v1968_v57, %v983_v32 }
 0x332   : > { %v1598_v47 = vpop.eup %1597  ;;  %1617 = vpow2.f32 %v1398_v42  ;;  %v1509_v48 = vpop.f32.mrf.mxu1 }
 0x333   : > { %1619 = vrcp.f32 %v1052_v23  ;;  %v1050_v49 = vadd.f32 1.0, %v1598_v47  ;;  %v1401_v50 = vmul.f32 -1.442695, %v984_v46  ;;  %v995_v51 = vadd.f32 %v1509_v48, %v1968_v57 }
 0x334   : > { %v1600_v52 = vpop.eup %1599  ;;  %1621 = vpow2.f32 %v1403_v45  ;;  %v986_v53 = vpop.f32.mrf.mxu1 }
 0x335   : > { %1623 = vrcp.f32 %v1050_v49  ;;  %v1053_v54 = vadd.f32 1.0, %v1600_v52  ;;  %v1404_v55 = vmul.f32 -1.442695, %v995_v51  ;;  %v987_v24 = vadd.f32 %v1968_v57, %v986_v53 }
 0x336   : > { %v1602_v56 = vpop.eup %1601  ;;  %1625 = vpow2.f32 %v1401_v50 }
 0x337   : > { %1627 = vrcp.f32 %v1053_v54  ;;  %v1051_v25 = vadd.f32 1.0, %v1602_v56  ;;  %v1402_v37 = vmul.f32 -1.442695, %v987_v24 }
 0x338   : > { %v1604_v26 = vpop.eup %1603  ;;  %1629 = vpow2.f32 %v1404_v55 }
 0x339   : > { %v1606_v60 = vpop.eup %1605  ;;  %v1101_v61 = vmul.f32 %v1604_v26, %v1989_v59  ;;  %1631 = vrcp.f32 %v1051_v25 }
 0x33a   : > { %v1608_v62 = vpop.eup %1607  ;;  %v1056_v63 = vadd.f32 1.0, %v1606_v60  ;;  %1633 = vpow2.f32 %v1402_v37 }
 0x33b   : > { %v1610_v0 = vpop.eup %1609  ;;  %v1127_v57 = vrot.slane %v1101_v61, 4  ;;  %v1099_v1 = vmul.f32 %v1608_v62, %v1989_v59 }
 0x33c   : > { %v1612_v31 = vpop.eup %1611  ;;  %1635 = vrcp.f32 %v1056_v63  ;;  %v1054_v2 = vadd.f32 1.0, %v1610_v0 }
 0x33d   : > { %v1614_v3 = vpop.eup %1613  ;;  %v1115_v4 = vrot.slane %v1099_v1, 4  ;;  %v1102_v5 = vmul.f32 %v1612_v31, %v1989_v59  ;;  %v1128_v9 = vadd.f32 %v1127_v57, %v1101_v61 }
 0x33e   : > { %v1616_v6 = vpop.eup %1615  ;;  %1637 = vrcp.f32 %v1054_v2  ;;  %v1057_v7 = vadd.f32 1.0, %v1614_v3 }
 0x33f   : > { %v1618_v8 = vpop.eup %1617  ;;  %v1116_v10 = vadd.f32 %v1115_v4, %v1099_v1  ;;  %v1133_v11 = vrot.slane %v1102_v5, 4  ;;  %v1100_v12 = vmul.f32 %v1616_v6, %v1989_v59  ;;  %v1129_v28 = vrot.slane %v1128_v9, 2 }
 0x340   : > { %v1620_v13 = vpop.eup %1619  ;;  %1639 = vrcp.f32 %v1057_v7  ;;  %v1055_v14 = vadd.f32 1.0, %v1618_v8 }
 0x341   : > { %v1622_v15 = vpop.eup %1621  ;;  %v1117_v16 = vrot.slane %v1116_v10, 2  ;;  %v1134_v17 = vadd.f32 %v1133_v11, %v1102_v5  ;;  %v1121_v18 = vrot.slane %v1100_v12, 4  ;;  %v1105_v20 = vmul.f32 %v1620_v13, %v1989_v59 }
 0x342   : > { %v1624_v19 = vpop.eup %1623  ;;  %1641 = vrcp.f32 %v1055_v14  ;;  %v1060_v21 = vadd.f32 1.0, %v1622_v15  ;;  %v1130_v44 = vadd.f32 %v1129_v28, %v1128_v9 }
 0x343   : > { %v1626_v27 = vpop.eup %1625  ;;  %v1118_v29 = vadd.f32 %v1117_v16, %v1116_v10  ;;  %v1122_v30 = vadd.f32 %v1121_v18, %v1100_v12  ;;  %v1151_v34 = vrot.slane %v1105_v20, 4  ;;  %v1103_v35 = vmul.f32 %v1624_v19, %v1989_v59 }
 0x344   : > { %v1628_v33 = vpop.eup %1627  ;;  %1643 = vrcp.f32 %v1060_v21  ;;  %v1058_v36 = vadd.f32 1.0, %v1626_v27  ;;  %v1135_v22 = vrot.slane %v1134_v17, 2  ;;  %v1131_v25 = vrot.slane %v1130_v44, 1 }
 0x345   : > { %v1630_v38 = vpop.eup %1629  ;;  %v1123_v39 = vrot.slane %v1122_v30, 2  ;;  %v1152_v41 = vadd.f32 %v1151_v34, %v1105_v20  ;;  %v1139_v42 = vrot.slane %v1103_v35, 4  ;;  %v1106_v43 = vmul.f32 %v1628_v33, %v1989_v59 }
 0x346   : > { %v1632_v40 = vpop.eup %1631  ;;  %1645 = vrcp.f32 %v1058_v36  ;;  %v1119_v32 = vrot.slane %v1118_v29, 1  ;;  %v1136_v50 = vadd.f32 %v1135_v22, %v1134_v17  ;;  %v1061_v53 = vadd.f32 1.0, %v1630_v38 }
 0x347   : > { %v1124_v23 = vadd.f32 %v1123_v39, %v1122_v30  ;;  %v1634_v45 = vpop.eup %1633  ;;  %v1140_v46 = vadd.f32 %v1139_v42, %v1103_v35  ;;  %v1157_v47 = vrot.slane %v1106_v43, 4  ;;  %v1104_v48 = vmul.f32 %v1632_v40, %v1989_v59 }
 0x348   : > { %v1153_v52 = vrot.slane %v1152_v41, 2  ;;  %v1120_v37 = vadd.f32 %v1119_v32, %v1118_v29  ;;  %1647 = vrcp.f32 %v1061_v53  ;;  %v1059_v26 = vadd.f32 1.0, %v1634_v45 }
 0x349   : > { %v1636_v49 = vpop.eup %1635  ;;  %v1125_v51 = vrot.slane %v1124_v23, 1  ;;  %v1141_v54 = vrot.slane %v1140_v46, 2  ;;  %v1158_v55 = vadd.f32 %v1157_v47, %v1106_v43  ;;  %v1145_v24 = vrot.slane %v1104_v48, 4 }
 0x34a   : > { %v1109_v56 = vmul.f32 %v1636_v49, %v1989_v59  ;;  %v1137_v57 = vrot.slane %v1136_v50, 1  ;;  %1649 = vrcp.f32 %v1059_v26  ;;  %v1154_v5 = vadd.f32 %v1153_v52, %v1152_v41 }
 0x34b   : > { %v1638_v58 = vpop.eup %1637  ;;  %v1142_v60 = vadd.f32 %v1141_v54, %v1140_v46  ;;  %v1146_v61 = vadd.f32 %v1145_v24, %v1104_v48  ;;  %v1126_v1 = vadd.f32 %v1125_v51, %v1124_v23  ;;  %v1159_v31 = vrot.slane %v1158_v55, 2 }
 0x34c   : > { %v1175_v62 = vrot.slane %v1109_v56, 4  ;;  %v1107_v63 = vmul.f32 %v1638_v58, %v1989_v59  ;;  %v1132_v7 = vadd.f32 %v1131_v25, %v1130_v44  ;;  %v1211_v16 = vmul.f32 0.16666667, %v1120_v37 }
 0x34d   : > { %v1640_v0 = vpop.eup %1639  ;;  %v1147_v2 = vrot.slane %v1146_v61, 2  ;;  %v1143_v8 = vrot.slane %v1142_v60, 1  ;;  %v1160_v10 = vadd.f32 %v1159_v31, %v1158_v55  ;;  %v1138_v17 = vadd.f32 %v1137_v57, %v1136_v50 }
 0x34e   : > { %v1176_v3 = vadd.f32 %v1175_v62, %v1109_v56  ;;  %v1163_v4 = vrot.slane %v1107_v63, 4  ;;  %v1110_v9 = vmul.f32 %v1640_v0, %v1989_v59  ;;  %v1212_v18 = vmul.f32 0.16666667, %v1126_v1 }
 0x34f   : > { %v1642_v6 = vpop.eup %1641  ;;  %v1148_v11 = vadd.f32 %v1147_v2, %v1146_v61  ;;  %v1155_v28 = vrot.slane %v1154_v5, 1  ;;  %v1144_v33 = vadd.f32 %v1143_v8, %v1142_v60  ;;  %v1161_v35 = vrot.slane %v1160_v10, 1 }
 0x350   : > { %v1177_v12 = vrot.slane %v1176_v3, 2  ;;  %v1164_v13 = vadd.f32 %v1163_v4, %v1107_v63  ;;  %v1108_v14 = vmul.f32 %v1642_v6, %v1989_v59  ;;  %v1181_v19 = vrot.slane %v1110_v9, 4 }
 0x351   : > { %v1644_v15 = vpop.eup %1643  ;;  %v1149_v34 = vrot.slane %v1148_v11, 1  ;;  %v1213_v40 = vmul.f32 0.16666667, %v1132_v7  ;;  %v1244_v45 = vsel %vm1243_vm3, %v1212_v18, %v1211_v16  ;;  %v1214_v46 = vmul.f32 0.16666667, %v1138_v17 }
 0x352   : > { %v1165_v20 = vrot.slane %v1164_v13, 2  ;;  %v1169_v21 = vrot.slane %v1108_v14, 4  ;;  %v1113_v27 = vmul.f32 %v1644_v15, %v1989_v59  ;;  %v1182_v30 = vadd.f32 %v1181_v19, %v1110_v9 }
 0x353   : > { %v1646_v29 = vpop.eup %1645  ;;  %v1178_v36 = vadd.f32 %v1177_v12, %v1176_v3  ;;  %v1150_v43 = vadd.f32 %v1149_v34, %v1148_v11  ;;  %v1156_v48 = vadd.f32 %v1155_v28, %v1154_v5  ;;  %v1162_v49 = vadd.f32 %v1161_v35, %v1160_v10 }
 0x354   : > { %v1166_v38 = vadd.f32 %v1165_v20, %v1164_v13  ;;  %v1170_v22 = vadd.f32 %v1169_v21, %v1108_v14  ;;  %v1199_v39 = vrot.slane %v1113_v27, 4  ;;  %v1183_v41 = vrot.slane %v1182_v30, 2 }
 0x355   : > { %v1111_v42 = vmul.f32 %v1646_v29, %v1989_v59  ;;  %v1648_v50 = vpop.eup %1647  ;;  %v1179_v51 = vrot.slane %v1178_v36, 1  ;;  %v1215_v54 = vmul.f32 0.16666667, %v1144_v33  ;;  %v1216_v56 = vmul.f32 0.16666667, %v1150_v43 }
 0x356   : > { %v1167_v44 = vrot.slane %v1166_v38, 1  ;;  %v1171_v32 = vrot.slane %v1170_v22, 2  ;;  %v1200_v23 = vadd.f32 %v1199_v39, %v1113_v27  ;;  %v1184_v52 = vadd.f32 %v1183_v41, %v1182_v30 }
 0x357   : > { %v1187_v47 = vrot.slane %v1111_v42, 4  ;;  %v1114_v24 = vmul.f32 %v1648_v50, %v1989_v59  ;;  %v1246_v58 = vsel %vm1245_vm4, %v1213_v40, %v1244_v45  ;;  %v1650_v25 = vpop.eup %1649  ;;  %v1217_v57 = vmul.f32 0.16666667, %v1156_v48 }
 0x358   : > { %v1172_v53 = vadd.f32 %v1171_v32, %v1170_v22  ;;  %v1168_v37 = vadd.f32 %v1167_v44, %v1166_v38  ;;  %v1201_v60 = vrot.slane %v1200_v23, 2  ;;  %v1248_v61 = vsel %vm1247_vm5, %v1214_v46, %v1246_v58 }
 0x359   : > { %v1188_v55 = vadd.f32 %v1187_v47, %v1111_v42  ;;  %v1205_v63 = vrot.slane %v1114_v24, 4  ;;  %v1112_v0 = vmul.f32 %v1650_v25, %v1989_v59  ;;  %v1180_v1 = vadd.f32 %v1179_v51, %v1178_v36 }
 0x35a   : > { %v1173_v26 = vrot.slane %v1172_v53, 1  ;;  %v1185_v31 = vrot.slane %v1184_v52, 1  ;;  %v1218_v3 = vmul.f32 0.16666667, %v1162_v49  ;;  %v1250_v7 = vsel %vm1249_vm6, %v1215_v54, %v1248_v61 }
 0x35b   : > { %v1189_v62 = vrot.slane %v1188_v55, 2  ;;  %v1206_v5 = vadd.f32 %v1205_v63, %v1114_v24  ;;  %v1193_v6 = vrot.slane %v1112_v0, 4  ;;  %v1219_v8 = vmul.f32 0.16666667, %v1168_v37 }
 0x35c   : > { %v1174_v2 = vadd.f32 %v1173_v26, %v1172_v53  ;;  %v1202_v10 = vadd.f32 %v1201_v60, %v1200_v23  ;;  %v1252_v11 = vsel %vm1251_vm7, %v1216_v56, %v1250_v7  ;;  %v1186_v16 = vadd.f32 %v1185_v31, %v1184_v52 }
 0x35d   : > { %v1190_v4 = vadd.f32 %v1189_v62, %v1188_v55  ;;  %v1194_v13 = vadd.f32 %v1193_v6, %v1112_v0  ;;  %v1207_v59 = vrot.slane %v1206_v5, 2  ;;  %v1254_v14 = vsel %vm1253_vm8, %v1217_v57, %v1252_v11 }
 0x35e   : > { %v1220_v9 = vmul.f32 0.16666667, %v1174_v2  ;;  %v1256_v15 = vsel %vm1255_vm9, %v1218_v3, %v1254_v14  ;;  %v1221_v20 = vmul.f32 0.16666667, %v1180_v1  ;;  %v1203_v27 = vrot.slane %v1202_v10, 1 }
 0x35f   : > { %v1191_v12 = vrot.slane %v1190_v4, 1  ;;  %v1195_v17 = vrot.slane %v1194_v13, 2  ;;  %v1208_v18 = vadd.f32 %v1207_v59, %v1206_v5  ;;  %1266 = vst [vmem:[%s315_s10] sm:$0xff] %v1256_v15  ;;  %v1222_v33 = vmul.f32 0.16666667, %v1186_v16 }
 0x360   : > { %v1257_v19 = vsel %vm1243_vm3, %v1220_v9, %v1219_v8  ;;  %v1204_v35 = vadd.f32 %v1203_v27, %v1202_v10 }
 0x361   : > { %v1192_v21 = vadd.f32 %v1191_v12, %v1190_v4  ;;  %v1196_v28 = vadd.f32 %v1195_v17, %v1194_v13  ;;  %v1209_v29 = vrot.slane %v1208_v18, 1  ;;  %v1258_v30 = vsel %vm1245_vm4, %v1221_v20, %v1257_v19 }
 0x362   : > { %v1259_v39 = vsel %vm1247_vm5, %v1222_v33, %v1258_v30  ;;  %v1225_v41 = vmul.f32 0.16666667, %v1204_v35 }
 0x363   : > { %v1197_v34 = vrot.slane %v1196_v28, 1  ;;  %v1223_v36 = vmul.f32 0.16666667, %v1192_v21  ;;  %v1210_v22 = vadd.f32 %v1209_v29, %v1208_v18 }
 0x365   : > { %v1198_v38 = vadd.f32 %v1197_v34, %v1196_v28  ;;  %v1260_v42 = vsel %vm1249_vm6, %v1223_v36, %v1259_v39  ;;  %v1226_v43 = vmul.f32 0.16666667, %v1210_v22 }
 0x367   : > { %v1224_v40 = vmul.f32 0.16666667, %v1198_v38 }
 0x369   : > { %v1261_v44 = vsel %vm1251_vm7, %v1224_v40, %v1260_v42 }
 0x36a   : > { %v1262_v32 = vsel %vm1253_vm8, %v1225_v41, %v1261_v44 }
 0x36b   : > { %v1263_v23 = vsel %vm1255_vm9, %v1226_v43, %v1262_v32 }
 0x36c   : > { %1267 = vst [vmem:[%s315_s10 + $0x8] sm:$0xff] %v1263_v23 }
 0x36d   : > { %1664 = shalt.err (!%p1661_p4)
}
 0x36e   : > { %s1665_s24 = scalar_lea.hbm %s2026_s19, 256  ;;  %s1669_s10 = scalar_lea.hbm %s2082_s8, 512 }
 0x36f   : > { %p1666_p7 = scmp.ne.s32.totalorder %s2026_s19, %s1665_s24  ;;  %p1670_p10 = scmp.lt.s32.totalorder %s2026_s19, %s2082_s8 }
 0x370   : > { %p1671_p11 = scmp.lt.s32.totalorder %s1669_s10, %s1665_s24 }
 0x371   : > { %p1667_p8 = pnand %p1666_p7, %p1802_p5 }
 0x372   : > { %p1672_p12 = por %p1671_p11, %p1670_p10 }
 0x373   : > { %p1668_p9 = pneg %p1667_p8 }
 0x375   : > { %p1673_p13 = pnand %p1672_p12, %p1668_p9 }
 0x377   : > { %1676 = shalt.err (!%p1673_p13)
}
 0x378   : > { %s1717_s18 = smov 128   ;;  %s1718_s20 = smov 8  }
 0x379   : > { %1526 = dma.vmem_to_hbm [thread:$0]  (%p1802_p5), %s2028_s13, 256, %s2026_s19, %s2034_s9, %s1717_s18, %s1717_s18, %s1718_s20  }
 0x37a PF: > { %p1532_p0 = scmp.ge.s32.totalorder %s1711_s30, 2  ;;  %s1297_s21 = sand.u32 1, %s1699_s27  }
 0x37b   : > { %s1298_s22 = scalar_lea.sflag [#allocation3], %s1297_s21 }
 0x37c   : > { %p1529_p1 = pnand %p1532_p0, %p1806_p6 }
 0x37e   : > { %p1530_p2 = pneg %p1529_p1 }
 0x380   : > { %1694 = dma.done.wait (%p1530_p2), %s1298_s22, 256  }
 0x381   : > { %1696 = vsyncadd (%p1530_p2), %s1298_s22, 4294967040  ;;  %p18_p3 = scmp.ge.s32.totalorder %s1789_s11, 4   ;;  %s2085_s27 = smov %s1703_s28 }
 0x382   : > { %s2086_s28 = smov %s1707_s29  ;;  %s2087_s29 = smov %s1800_s14 }
 0x383   : > { %s2088_s30 = smov %s1789_s11  ;;  %20 = sbr.rel (!%p18_p3) target bundleno = 3 (0x3), region = 90 }
 0x388   :  { %1303 = vsyncpa [#allocation3], 1 }
 0x389   :  { %1305 = vsyncpa [#allocation3 + $0x1], 1 }

</bundles_post_ra>
